<compile_context>
chip_gen: v6e
topology: v6e:2x2x1
jax: 0.10.0
libtpu: 0.0.40
codegen_flags: <defaults>
</compile_context>

<pallas_src>
import jax
import jax.numpy as jnp
from jax import lax
from jax.experimental import pallas as pl
from jax.experimental.pallas import tpu as pltpu


def pool_agg_kernel(x_ref, neibs_ref, wm_ref, bm_ref, wx_ref, wn_ref, out_ref):
    # x_ref:     (TN, D)      bf16   node-feature tile
    # neibs_ref: (K, TN, D)   bf16   k-th neighbor of every node in the tile
    # wm_ref:    (D, H)       bf16   MLP weight       bm_ref: (1, H) f32 bias
    # wx_ref:    (D, O)       bf16   fc_x weight
    # wn_ref:    (H, O)       bf16   fc_neib weight, pre-scaled by 1/K
    # out_ref:   (TN, 2*O)    out dtype
    k_tot, tn, _ = neibs_ref.shape
    h_dim = wm_ref.shape[1]
    o_dim = wx_ref.shape[1]

    # Hoisted out of the K loop (JAX does not CSE repeated loads/broadcasts).
    bias = bm_ref[...]                                   # (1, H) f32

    # Streamed neighbor MLP + mean pool: per step only one (TN, H) chunk is
    # live; the mean's 1/K scale is folded into W_neib, so we just sum.
    def body(k, acc):
        hk = jnp.dot(neibs_ref[k], wm_ref[...],
                     preferred_element_type=jnp.float32)  # (TN, H) f32 on MXU
        return acc + jnp.maximum(hk + bias, 0.0)          # bias + ReLU + accumulate

    agg = lax.fori_loop(0, k_tot, body,
                        jnp.zeros((tn, h_dim), jnp.float32), unroll=True)

    # fc_x(x) and fc_neib(agg); combine_fn = concat along features, written as
    # two lane-aligned slice stores (no jnp.concatenate / extra VMEM buffer).
    ox = jnp.dot(x_ref[...], wx_ref[...], preferred_element_type=jnp.float32)
    on = jnp.dot(agg.astype(wn_ref.dtype), wn_ref[...],
                 preferred_element_type=jnp.float32)

    # activation = ReLU
    out_ref[:, :o_dim] = jnp.maximum(ox, 0.0).astype(out_ref.dtype)
    out_ref[:, o_dim:] = jnp.maximum(on, 0.0).astype(out_ref.dtype)


def pool_aggregator(x, neibs, w_mlp, b_mlp, w_x, w_neib, *,
                    tile_n=128, min_grid=4, out_dtype=None):
    n, d = x.shape
    nk = neibs.shape[0]
    assert nk % n == 0, "neibs must hold K contiguous rows per node"
    k = nk // n
    h_dim = w_mlp.shape[1]
    o_dim = w_x.shape[1]
    out_dtype = x.dtype if out_dtype is None else out_dtype

    # Node tile: multiple of 16 sublanes (bf16 native (16,128) tiling), capped
    # by tile_n, and small enough that the grid has >= min_grid steps so each
    # TensorCore (v7x megacore) gets >= 2 pipelined steps to hide the neibs DMA.
    tile = min(tile_n, max(16, -(-n // min_grid)))
    tile = -(-tile // 16) * 16
    n_pad = -(-n // tile) * tile
    grid = (n_pad // tile,)

    # bf16 operands / f32 accumulation for all three MXU matmuls.  neibs is
    # re-laid-out as (K, N, D) so the kernel can stream one neighbor per step;
    # the transpose fuses with the bf16 cast (single HBM pass, same bytes as
    # the plain cast).  Fold the 1/K mean scale into the fc_neib weight.
    bf = jnp.bfloat16
    x_b = x.astype(bf)
    neibs_t = neibs.reshape(n, k, d).transpose(1, 0, 2).astype(bf)   # (K, N, D)
    if n_pad != n:
        x_b = jnp.pad(x_b, ((0, n_pad - n), (0, 0)))
        neibs_t = jnp.pad(neibs_t, ((0, 0), (0, n_pad - n), (0, 0)))
    wm_b = w_mlp.astype(bf)
    wx_b = w_x.astype(bf)
    wn_b = (w_neib * (1.0 / k)).astype(bf)
    bm = b_mlp.astype(jnp.float32).reshape(1, h_dim)

    out_bytes = jnp.dtype(out_dtype).itemsize
    flops = 2 * n_pad * (k * d * h_dim + d * o_dim + h_dim * o_dim)
    bytes_accessed = (
        (n_pad * k * d + n_pad * d) * 2                       # bf16 streamed inputs
        + (d * h_dim + d * o_dim + h_dim * o_dim) * 2         # bf16 weights (resident, once)
        + h_dim * 4                                           # f32 bias (once)
        + n_pad * 2 * o_dim * out_bytes)                      # output writeback
    cost = pl.CostEstimate(flops=int(flops), transcendentals=0,
                           bytes_accessed=int(bytes_accessed))

    out = pl.pallas_call(
        pool_agg_kernel,
        out_shape=jax.ShapeDtypeStruct((n_pad, 2 * o_dim), out_dtype),
        grid_spec=pltpu.PrefetchScalarGridSpec(
            num_scalar_prefetch=0,
            grid=grid,
            in_specs=[
                pl.BlockSpec((tile, d),       lambda i: (i, 0)),      # x tile
                pl.BlockSpec((k, tile, d),    lambda i: (0, i, 0)),   # neibs (K, tile, D)
                pl.BlockSpec((d, h_dim),      lambda i: (0, 0)),      # W_mlp (resident)
                pl.BlockSpec((1, h_dim),      lambda i: (0, 0)),      # b_mlp (resident)
                pl.BlockSpec((d, o_dim),      lambda i: (0, 0)),      # W_x   (resident)
                pl.BlockSpec((h_dim, o_dim),  lambda i: (0, 0)),      # W_neib (1/K folded)
            ],
            out_specs=pl.BlockSpec((tile, 2 * o_dim), lambda i: (i, 0)),
        ),
        compiler_params=pltpu.CompilerParams(
            # Node tiles are independent -> shard the grid across TensorCores.
            dimension_semantics=("parallel",)),
        cost_estimate=cost,
    )(x_b, neibs_t, wm_b, bm, wx_b, wn_b)
    return out[:n]


def reference(x, neibs, w_mlp, b_mlp, w_x, w_neib):
    n = x.shape[0]
    h = jax.nn.relu(neibs @ w_mlp + b_mlp)
    agg = h.reshape(n, -1, h.shape[1]).mean(axis=1)
    out = jnp.concatenate([x @ w_x, agg @ w_neib], axis=1)
    return jax.nn.relu(out)


if __name__ == "__main__":
    # N nodes, K neighbors per node, input_dim D, hidden_dim H, output_dim O.
    # Small shapes; tile selection yields grid=4 (>= 2 steps per TensorCore).
    N, K, D, H, O = 128, 8, 128, 256, 128

    key = jax.random.PRNGKey(0)
    kx, kn, k1, k2, k3, k4 = jax.random.split(key, 6)

    x     = jax.random.normal(kx, (N, D), dtype=jnp.float32)
    neibs = jax.random.normal(kn, (N * K, D), dtype=jnp.float32)

    # Deterministic parameter init (shapes from __init__); stored as (in, out).
    w_mlp  = jax.random.normal(k1, (D, H), dtype=jnp.float32) * 0.05
    b_mlp  = jax.random.normal(k2, (1, H), dtype=jnp.float32) * 0.05
    w_x    = jax.random.normal(k3, (D, O), dtype=jnp.float32) * 0.05
    w_neib = jax.random.normal(k4, (H, O), dtype=jnp.float32) * 0.05

    ref = reference(x, neibs, w_mlp, b_mlp, w_x, w_neib)

    # f32 output (default: matches input dtype).
    out = pool_aggregator(x, neibs, w_mlp, b_mlp, w_x, w_neib)
    out = jax.block_until_ready(out)
    assert out.shape == (N, 2 * O)
    # bf16 operands / f32 accumulation vs. pure-f32 reference.
    assert jnp.allclose(out, ref, atol=3e-2, rtol=3e-2), "mismatch vs reference"

    # bf16 output path (halves HBM writeback on HBM-bound chips).
    out_bf = pool_aggregator(x, neibs, w_mlp, b_mlp, w_x, w_neib,
                             out_dtype=jnp.bfloat16)
    out_bf = jax.block_until_ready(out_bf)
    assert out_bf.dtype == jnp.bfloat16
    assert jnp.allclose(out_bf.astype(jnp.float32), ref, atol=5e-2, rtol=5e-2), \
        "mismatch vs reference (bf16 output)"

    # Ragged-N path (N not a multiple of the tile): wrapper zero-pads; tile
    # stays a multiple of 16 so bf16 sublane tiling is respected.
    N2 = 40
    x2, n2 = x[:N2], neibs[: N2 * K]
    out2 = pool_aggregator(x2, n2, w_mlp, b_mlp, w_x, w_neib)
    out2 = jax.block_until_ready(out2)
    ref2 = reference(x2, n2, w_mlp, b_mlp, w_x, w_neib)
    assert out2.shape == (N2, 2 * O)
    assert jnp.allclose(out2, ref2, atol=3e-2, rtol=3e-2), "mismatch (ragged N)"

    print("KERNEL_OK")
</pallas_src>

<mosaic_0001>
module attributes {stable_mosaic.version = 11 : i64} {
  func.func @pool_agg_kernel(%arg0: i32, %arg1: memref<32x128xbf16, #tpu.memory_space<vmem>>, %arg2: memref<8x32x128xbf16, #tpu.memory_space<vmem>>, %arg3: memref<128x256xbf16, #tpu.memory_space<vmem>>, %arg4: memref<1x256xf32, #tpu.memory_space<vmem>>, %arg5: memref<128x128xbf16, #tpu.memory_space<vmem>>, %arg6: memref<256x128xbf16, #tpu.memory_space<vmem>>, %arg7: memref<32x256xf32, #tpu.memory_space<vmem>>) attributes {dimension_semantics = [#tpu.dimension_semantics<parallel>], iteration_bounds = array<i64: 4>, scalar_prefetch = 0 : i64, scratch_operands = 0 : i64, tpu.core_type = #tpu.core_type<tc>, window_params = [{transform_indices = @transform_0, window_bounds = array<i64: 32, 128>}, {transform_indices = @transform_1, window_bounds = array<i64: 8, 32, 128>}, {pipeline_mode = #tpu.pipeline_mode<synchronous>, transform_indices = @transform_2, window_bounds = array<i64: 128, 256>}, {pipeline_mode = #tpu.pipeline_mode<synchronous>, transform_indices = @transform_3, window_bounds = array<i64: 1, 256>}, {pipeline_mode = #tpu.pipeline_mode<synchronous>, transform_indices = @transform_4, window_bounds = array<i64: 128, 128>}, {pipeline_mode = #tpu.pipeline_mode<synchronous>, transform_indices = @transform_5, window_bounds = array<i64: 256, 128>}, {transform_indices = @transform_6, window_bounds = array<i64: 32, 256>}]} {
    %c0 = arith.constant 0 : index
    %c0_0 = arith.constant 0 : index
    %0 = vector.load %arg4[%c0, %c0_0] : memref<1x256xf32, #tpu.memory_space<vmem>>, vector<1x256xf32>
    %cst = arith.constant 0.000000e+00 : f32
    %1 = vector.broadcast %cst : f32 to vector<32x256xf32>
    %c0_i32 = arith.constant 0 : i32
    %2 = arith.index_cast %c0_i32 : i32 to index
    %c0_1 = arith.constant 0 : index
    %c0_2 = arith.constant 0 : index
    %3 = vector.load %arg2[%2, %c0_1, %c0_2] : memref<8x32x128xbf16, #tpu.memory_space<vmem>>, vector<1x32x128xbf16>
    %4 = vector.shape_cast %3 : vector<1x32x128xbf16> to vector<32x128xbf16>
    %c0_3 = arith.constant 0 : index
    %c0_4 = arith.constant 0 : index
    %5 = vector.load %arg3[%c0_3, %c0_4] : memref<128x256xbf16, #tpu.memory_space<vmem>>, vector<128x256xbf16>
    %cst_5 = arith.constant dense<0.000000e+00> : vector<32x256xf32>
    %6 = tpu.matmul %4, %5, %cst_5 {dimension_numbers = #tpu.dot_dimension_numbers<[1], [0], [0], [1], [0, 0, 1, 1], [], []>} : vector<32x128xbf16>, vector<128x256xbf16>, vector<32x256xf32> -> vector<32x256xf32>
    %7 = vector.broadcast %0 : vector<1x256xf32> to vector<32x256xf32>
    %8 = arith.addf %6, %7 : vector<32x256xf32>
    %cst_6 = arith.constant 0.000000e+00 : f32
    %9 = vector.broadcast %cst_6 : f32 to vector<32x256xf32>
    %10 = arith.maximumf %8, %9 : vector<32x256xf32>
    %11 = arith.addf %1, %10 : vector<32x256xf32>
    %c1_i32 = arith.constant 1 : i32
    %12 = arith.index_cast %c1_i32 : i32 to index
    %c0_7 = arith.constant 0 : index
    %c0_8 = arith.constant 0 : index
    %13 = vector.load %arg2[%12, %c0_7, %c0_8] : memref<8x32x128xbf16, #tpu.memory_space<vmem>>, vector<1x32x128xbf16>
    %14 = vector.shape_cast %13 : vector<1x32x128xbf16> to vector<32x128xbf16>
    %c0_9 = arith.constant 0 : index
    %c0_10 = arith.constant 0 : index
    %15 = vector.load %arg3[%c0_9, %c0_10] : memref<128x256xbf16, #tpu.memory_space<vmem>>, vector<128x256xbf16>
    %cst_11 = arith.constant dense<0.000000e+00> : vector<32x256xf32>
    %16 = tpu.matmul %14, %15, %cst_11 {dimension_numbers = #tpu.dot_dimension_numbers<[1], [0], [0], [1], [0, 0, 1, 1], [], []>} : vector<32x128xbf16>, vector<128x256xbf16>, vector<32x256xf32> -> vector<32x256xf32>
    %17 = vector.broadcast %0 : vector<1x256xf32> to vector<32x256xf32>
    %18 = arith.addf %16, %17 : vector<32x256xf32>
    %cst_12 = arith.constant 0.000000e+00 : f32
    %19 = vector.broadcast %cst_12 : f32 to vector<32x256xf32>
    %20 = arith.maximumf %18, %19 : vector<32x256xf32>
    %21 = arith.addf %11, %20 : vector<32x256xf32>
    %c2_i32 = arith.constant 2 : i32
    %22 = arith.index_cast %c2_i32 : i32 to index
    %c0_13 = arith.constant 0 : index
    %c0_14 = arith.constant 0 : index
    %23 = vector.load %arg2[%22, %c0_13, %c0_14] : memref<8x32x128xbf16, #tpu.memory_space<vmem>>, vector<1x32x128xbf16>
    %24 = vector.shape_cast %23 : vector<1x32x128xbf16> to vector<32x128xbf16>
    %c0_15 = arith.constant 0 : index
    %c0_16 = arith.constant 0 : index
    %25 = vector.load %arg3[%c0_15, %c0_16] : memref<128x256xbf16, #tpu.memory_space<vmem>>, vector<128x256xbf16>
    %cst_17 = arith.constant dense<0.000000e+00> : vector<32x256xf32>
    %26 = tpu.matmul %24, %25, %cst_17 {dimension_numbers = #tpu.dot_dimension_numbers<[1], [0], [0], [1], [0, 0, 1, 1], [], []>} : vector<32x128xbf16>, vector<128x256xbf16>, vector<32x256xf32> -> vector<32x256xf32>
    %27 = vector.broadcast %0 : vector<1x256xf32> to vector<32x256xf32>
    %28 = arith.addf %26, %27 : vector<32x256xf32>
    %cst_18 = arith.constant 0.000000e+00 : f32
    %29 = vector.broadcast %cst_18 : f32 to vector<32x256xf32>
    %30 = arith.maximumf %28, %29 : vector<32x256xf32>
    %31 = arith.addf %21, %30 : vector<32x256xf32>
    %c3_i32 = arith.constant 3 : i32
    %32 = arith.index_cast %c3_i32 : i32 to index
    %c0_19 = arith.constant 0 : index
    %c0_20 = arith.constant 0 : index
    %33 = vector.load %arg2[%32, %c0_19, %c0_20] : memref<8x32x128xbf16, #tpu.memory_space<vmem>>, vector<1x32x128xbf16>
    %34 = vector.shape_cast %33 : vector<1x32x128xbf16> to vector<32x128xbf16>
    %c0_21 = arith.constant 0 : index
    %c0_22 = arith.constant 0 : index
    %35 = vector.load %arg3[%c0_21, %c0_22] : memref<128x256xbf16, #tpu.memory_space<vmem>>, vector<128x256xbf16>
    %cst_23 = arith.constant dense<0.000000e+00> : vector<32x256xf32>
    %36 = tpu.matmul %34, %35, %cst_23 {dimension_numbers = #tpu.dot_dimension_numbers<[1], [0], [0], [1], [0, 0, 1, 1], [], []>} : vector<32x128xbf16>, vector<128x256xbf16>, vector<32x256xf32> -> vector<32x256xf32>
    %37 = vector.broadcast %0 : vector<1x256xf32> to vector<32x256xf32>
    %38 = arith.addf %36, %37 : vector<32x256xf32>
    %cst_24 = arith.constant 0.000000e+00 : f32
    %39 = vector.broadcast %cst_24 : f32 to vector<32x256xf32>
    %40 = arith.maximumf %38, %39 : vector<32x256xf32>
    %41 = arith.addf %31, %40 : vector<32x256xf32>
    %c4_i32 = arith.constant 4 : i32
    %42 = arith.index_cast %c4_i32 : i32 to index
    %c0_25 = arith.constant 0 : index
    %c0_26 = arith.constant 0 : index
    %43 = vector.load %arg2[%42, %c0_25, %c0_26] : memref<8x32x128xbf16, #tpu.memory_space<vmem>>, vector<1x32x128xbf16>
    %44 = vector.shape_cast %43 : vector<1x32x128xbf16> to vector<32x128xbf16>
    %c0_27 = arith.constant 0 : index
    %c0_28 = arith.constant 0 : index
    %45 = vector.load %arg3[%c0_27, %c0_28] : memref<128x256xbf16, #tpu.memory_space<vmem>>, vector<128x256xbf16>
    %cst_29 = arith.constant dense<0.000000e+00> : vector<32x256xf32>
    %46 = tpu.matmul %44, %45, %cst_29 {dimension_numbers = #tpu.dot_dimension_numbers<[1], [0], [0], [1], [0, 0, 1, 1], [], []>} : vector<32x128xbf16>, vector<128x256xbf16>, vector<32x256xf32> -> vector<32x256xf32>
    %47 = vector.broadcast %0 : vector<1x256xf32> to vector<32x256xf32>
    %48 = arith.addf %46, %47 : vector<32x256xf32>
    %cst_30 = arith.constant 0.000000e+00 : f32
    %49 = vector.broadcast %cst_30 : f32 to vector<32x256xf32>
    %50 = arith.maximumf %48, %49 : vector<32x256xf32>
    %51 = arith.addf %41, %50 : vector<32x256xf32>
    %c5_i32 = arith.constant 5 : i32
    %52 = arith.index_cast %c5_i32 : i32 to index
    %c0_31 = arith.constant 0 : index
    %c0_32 = arith.constant 0 : index
    %53 = vector.load %arg2[%52, %c0_31, %c0_32] : memref<8x32x128xbf16, #tpu.memory_space<vmem>>, vector<1x32x128xbf16>
    %54 = vector.shape_cast %53 : vector<1x32x128xbf16> to vector<32x128xbf16>
    %c0_33 = arith.constant 0 : index
    %c0_34 = arith.constant 0 : index
    %55 = vector.load %arg3[%c0_33, %c0_34] : memref<128x256xbf16, #tpu.memory_space<vmem>>, vector<128x256xbf16>
    %cst_35 = arith.constant dense<0.000000e+00> : vector<32x256xf32>
    %56 = tpu.matmul %54, %55, %cst_35 {dimension_numbers = #tpu.dot_dimension_numbers<[1], [0], [0], [1], [0, 0, 1, 1], [], []>} : vector<32x128xbf16>, vector<128x256xbf16>, vector<32x256xf32> -> vector<32x256xf32>
    %57 = vector.broadcast %0 : vector<1x256xf32> to vector<32x256xf32>
    %58 = arith.addf %56, %57 : vector<32x256xf32>
    %cst_36 = arith.constant 0.000000e+00 : f32
    %59 = vector.broadcast %cst_36 : f32 to vector<32x256xf32>
    %60 = arith.maximumf %58, %59 : vector<32x256xf32>
    %61 = arith.addf %51, %60 : vector<32x256xf32>
    %c6_i32 = arith.constant 6 : i32
    %62 = arith.index_cast %c6_i32 : i32 to index
    %c0_37 = arith.constant 0 : index
    %c0_38 = arith.constant 0 : index
    %63 = vector.load %arg2[%62, %c0_37, %c0_38] : memref<8x32x128xbf16, #tpu.memory_space<vmem>>, vector<1x32x128xbf16>
    %64 = vector.shape_cast %63 : vector<1x32x128xbf16> to vector<32x128xbf16>
    %c0_39 = arith.constant 0 : index
    %c0_40 = arith.constant 0 : index
    %65 = vector.load %arg3[%c0_39, %c0_40] : memref<128x256xbf16, #tpu.memory_space<vmem>>, vector<128x256xbf16>
    %cst_41 = arith.constant dense<0.000000e+00> : vector<32x256xf32>
    %66 = tpu.matmul %64, %65, %cst_41 {dimension_numbers = #tpu.dot_dimension_numbers<[1], [0], [0], [1], [0, 0, 1, 1], [], []>} : vector<32x128xbf16>, vector<128x256xbf16>, vector<32x256xf32> -> vector<32x256xf32>
    %67 = vector.broadcast %0 : vector<1x256xf32> to vector<32x256xf32>
    %68 = arith.addf %66, %67 : vector<32x256xf32>
    %cst_42 = arith.constant 0.000000e+00 : f32
    %69 = vector.broadcast %cst_42 : f32 to vector<32x256xf32>
    %70 = arith.maximumf %68, %69 : vector<32x256xf32>
    %71 = arith.addf %61, %70 : vector<32x256xf32>
    %c7_i32 = arith.constant 7 : i32
    %72 = arith.index_cast %c7_i32 : i32 to index
    %c0_43 = arith.constant 0 : index
    %c0_44 = arith.constant 0 : index
    %73 = vector.load %arg2[%72, %c0_43, %c0_44] : memref<8x32x128xbf16, #tpu.memory_space<vmem>>, vector<1x32x128xbf16>
    %74 = vector.shape_cast %73 : vector<1x32x128xbf16> to vector<32x128xbf16>
    %c0_45 = arith.constant 0 : index
    %c0_46 = arith.constant 0 : index
    %75 = vector.load %arg3[%c0_45, %c0_46] : memref<128x256xbf16, #tpu.memory_space<vmem>>, vector<128x256xbf16>
    %cst_47 = arith.constant dense<0.000000e+00> : vector<32x256xf32>
    %76 = tpu.matmul %74, %75, %cst_47 {dimension_numbers = #tpu.dot_dimension_numbers<[1], [0], [0], [1], [0, 0, 1, 1], [], []>} : vector<32x128xbf16>, vector<128x256xbf16>, vector<32x256xf32> -> vector<32x256xf32>
    %77 = vector.broadcast %0 : vector<1x256xf32> to vector<32x256xf32>
    %78 = arith.addf %76, %77 : vector<32x256xf32>
    %cst_48 = arith.constant 0.000000e+00 : f32
    %79 = vector.broadcast %cst_48 : f32 to vector<32x256xf32>
    %80 = arith.maximumf %78, %79 : vector<32x256xf32>
    %81 = arith.addf %71, %80 : vector<32x256xf32>
    %c8_i32 = arith.constant 8 : i32
    %c0_49 = arith.constant 0 : index
    %c0_50 = arith.constant 0 : index
    %82 = vector.load %arg1[%c0_49, %c0_50] : memref<32x128xbf16, #tpu.memory_space<vmem>>, vector<32x128xbf16>
    %c0_51 = arith.constant 0 : index
    %c0_52 = arith.constant 0 : index
    %83 = vector.load %arg5[%c0_51, %c0_52] : memref<128x128xbf16, #tpu.memory_space<vmem>>, vector<128x128xbf16>
    %cst_53 = arith.constant dense<0.000000e+00> : vector<32x128xf32>
    %84 = tpu.matmul %82, %83, %cst_53 {dimension_numbers = #tpu.dot_dimension_numbers<[1], [0], [0], [1], [0, 0, 1, 1], [], []>} : vector<32x128xbf16>, vector<128x128xbf16>, vector<32x128xf32> -> vector<32x128xf32>
    %85 = arith.truncf %81 : vector<32x256xf32> to vector<32x256xbf16>
    %c0_54 = arith.constant 0 : index
    %c0_55 = arith.constant 0 : index
    %86 = vector.load %arg6[%c0_54, %c0_55] : memref<256x128xbf16, #tpu.memory_space<vmem>>, vector<256x128xbf16>
    %cst_56 = arith.constant dense<0.000000e+00> : vector<32x128xf32>
    %87 = tpu.matmul %85, %86, %cst_56 {dimension_numbers = #tpu.dot_dimension_numbers<[1], [0], [0], [1], [0, 0, 1, 1], [], []>} : vector<32x256xbf16>, vector<256x128xbf16>, vector<32x128xf32> -> vector<32x128xf32>
    %cst_57 = arith.constant 0.000000e+00 : f32
    %88 = vector.broadcast %cst_57 : f32 to vector<32x128xf32>
    %89 = arith.maximumf %84, %88 : vector<32x128xf32>
    %c0_58 = arith.constant 0 : index
    %c0_59 = arith.constant 0 : index
    %90 = vector.load %arg7[%c0_58, %c0_59] : memref<32x256xf32, #tpu.memory_space<vmem>>, vector<32x128xf32>
    tpu.vector_store %arg7[%c0_58, %c0_59], %89 {strides = array<i32>} : memref<32x256xf32, #tpu.memory_space<vmem>>, vector<32x128xf32>,
    %cst_60 = arith.constant 0.000000e+00 : f32
    %91 = vector.broadcast %cst_60 : f32 to vector<32x128xf32>
    %92 = arith.maximumf %87, %91 : vector<32x128xf32>
    %c0_61 = arith.constant 0 : index
    %c128 = arith.constant 128 : index
    %93 = vector.load %arg7[%c0_61, %c128] : memref<32x256xf32, #tpu.memory_space<vmem>>, vector<32x128xf32>
    tpu.vector_store %arg7[%c0_61, %c128], %92 {strides = array<i32>} : memref<32x256xf32, #tpu.memory_space<vmem>>, vector<32x128xf32>,
    return
  }
  func.func @transform_0(%arg0: i32) -> (i32, i32) {
    %c0_i32 = arith.constant 0 : i32
    %c0_i32_0 = arith.constant 0 : i32
    return %arg0, %c0_i32 : i32, i32
  }
  func.func @transform_1(%arg0: i32) -> (i32, i32, i32) {
    %c0_i32 = arith.constant 0 : i32
    %c0_i32_0 = arith.constant 0 : i32
    %c0_i32_1 = arith.constant 0 : i32
    return %c0_i32, %arg0, %c0_i32_0 : i32, i32, i32
  }
  func.func @transform_2(%arg0: i32) -> (i32, i32) {
    %c0_i32 = arith.constant 0 : i32
    %c0_i32_0 = arith.constant 0 : i32
    %c0_i32_1 = arith.constant 0 : i32
    return %c0_i32, %c0_i32_0 : i32, i32
  }
  func.func @transform_3(%arg0: i32) -> (i32, i32) {
    %c0_i32 = arith.constant 0 : i32
    %c0_i32_0 = arith.constant 0 : i32
    %c0_i32_1 = arith.constant 0 : i32
    return %c0_i32, %c0_i32_0 : i32, i32
  }
  func.func @transform_4(%arg0: i32) -> (i32, i32) {
    %c0_i32 = arith.constant 0 : i32
    %c0_i32_0 = arith.constant 0 : i32
    %c0_i32_1 = arith.constant 0 : i32
    return %c0_i32, %c0_i32_0 : i32, i32
  }
  func.func @transform_5(%arg0: i32) -> (i32, i32) {
    %c0_i32 = arith.constant 0 : i32
    %c0_i32_0 = arith.constant 0 : i32
    %c0_i32_1 = arith.constant 0 : i32
    return %c0_i32, %c0_i32_0 : i32, i32
  }
  func.func @transform_6(%arg0: i32) -> (i32, i32) {
    %c0_i32 = arith.constant 0 : i32
    %c0_i32_0 = arith.constant 0 : i32
    return %arg0, %c0_i32 : i32, i32
  }
}

</mosaic_0001>

<bundles_post_ra>
// kernel: tpu_custom_call.1
= control target key start
LH: loop header
LB: loop body
LE: loop exit
PB: predicated region body
PF: predicated region fallthrough
CT: control target
= control target key end

     0   :  { %s2781_s0 = inlined_call_operand.hbm [shape: bf16[128,128], index: 0, kind: input, shape index: {}]   ;;  %s2782_s1 = inlined_call_operand.hbm [shape: bf16[8,128,128], index: 1, kind: input, shape index: {}]   ;;  %s2783_s2 = inlined_call_operand.hbm [shape: bf16[128,256], index: 2, kind: input, shape index: {}]   ;;  %s2784_s3 = inlined_call_operand.vmem [shape: f32[1,256], index: 3, kind: input, shape index: {}]   ;;  %s2785_s4 = inlined_call_operand.hbm [shape: bf16[128,128], index: 4, kind: input, shape index: {}]   ;;  %s2786_s5 = inlined_call_operand.hbm [shape: bf16[256,128], index: 5, kind: input, shape index: {}]   ;;  %s2787_s6 = inlined_call_operand.hbm [shape: f32[128,256], index: 6, kind: output, shape index: {}]  }
   0x1   :  { %2792 = sst [smem:[#allocation20_spill]] %s2781_s0 }
   0x2   :  { %2793 = sst [smem:[#allocation21_spill]] %s2783_s2 }
   0x3   :  { %11 = vsyncpa [#allocation3], 0 }
   0x4   :  { %13 = vsyncpa [#allocation3 + $0x1], 0 }
   0x5   :  { %14 = vsyncpa [#allocation6], 0 }
   0x6   :  { %16 = vsyncpa [#allocation6 + $0x1], 0 }
   0x7   :  { %17 = vsyncpa [#allocation9], 0 }
   0x8   :  { %18 = vsyncpa [#allocation4], 0 }
   0x9   :  { %20 = vsyncpa [#allocation4 + $0x1], 0  ;;  %s2214_s21 = smov 0   ;;  %s2216_s22 = smov 0  }
   0xa   :  { %s2218_s23 = smov 0   ;;  %s2220_s24 = smov 0  }
   0xb LB: > { %s2235_s25 = sadd.s32 4294967295, %s2158_s24   ;;  %s1642_s26 = sadd.s32 4294967294, %s2158_s24   ;;  %s2158_s24 = sphi %s2220_s24, %s2813_s24   ;;  %s2154_s23 = sphi %s2218_s23, %s2812_s23   ;;  %s2150_s22 = sphi %s2216_s22, %s2811_s22   ;;  %s2146_s21 = sphi %s2214_s21, %s2810_s21  }
   0xc   : > { %s2239_s27 = sadd.s32 1, %s2158_s24   ;;  %s33_s28 = sadd.s32 1, %s2154_s23 }
   0xd   : > { %s30_s29 = ssub.s32 %s2158_s24, %s2239_s27  ;;  %p40_p0 = scmp.ne.s32.totalorder %s2154_s23, %s2150_s22 }
   0xe   : > { %p31_p1 = scmp.eq.s32.totalorder %s30_s29, 0  ;;  %p41_p2 = scmp.eq.s32.totalorder %s2158_s24, 0 }
   0xf   : > { %p46_p3 = scmp.ne.s32.totalorder %s2150_s22, %s2146_s21  ;;  %p2788_p4 = scmp.eq.s32.totalorder %s2235_s25, 0 }
  0x10   : > { %s2251_s30 = scalar_select %p31_p1, %s2154_s23, %s33_s28  }
  0x11   : > { %p2253_p5 = por %p41_p2, %p40_p0  ;;  %p2259_p6 = por %p2788_p4, %p46_p3 }
  0x12   : > { %p180_p7 = scmp.eq.s32.totalorder %s2235_s25, 3  ;;  %p186_p8 = scmp.eq.s32.totalorder %s1642_s26, 3 }
  0x13   : > { %s2795_s8 = scalar_select %p2259_p6, 1, 0 }
  0x14   : > { %p1643_p9 = scmp.ge.s32.totalorder %s2158_s24, 1  ;;  %p193_p10 = scmp.lt.s32.totalorder %s2158_s24, 5 }
  0x15   : > { %p2266_p11 = por %p180_p7, %p40_p0  ;;  %p2270_p12 = por %p186_p8, %p46_p3 }
  0x16   : > { %p2274_p13 = pnand %p1643_p9, %p193_p10  ;;  %s2160_s12 = smov [#allocation8]  }
  0x17   : > { %s2796_s9 = scalar_select %p2266_p11, 1, 0 }
  0x18   : > { %s2797_s10 = scalar_select %p2270_p12, 1, 0 }
  0x19   : > { %p1842_p1 = pneg %p2274_p13  ;;  %s221_s13 = sshll.u32 %s2160_s12, 4  ;;  %s222_s13 = int_to_ptr.vmem [resolvable:$true] %s221_s13 }
  0x1a   : > { %s2161_s15 = smov [#allocation7]   ;;  %s1989_s17 = scalar_lea.vmem %s222_s13, 1024 }
  0x1b   : > { %p2282_p2 = pnand %p1842_p1, %p2788_p4  ;;  %s205_s16 = sshll.u32 %s2161_s15, 4  ;;  %s206_s16 = int_to_ptr.vmem [resolvable:$true] %s205_s16 }
  0x1c   : > { %p1990_p3 = scmp.ne.s32.totalorder %s222_s13, %s1989_s17  ;;  %p1997_p9 = scmp.lt.s32.totalorder %s222_s13, %s222_s13 }
  0x1d   : > { %p1980_p0 = pneg %p2282_p2  ;;  %p1998_p10 = scmp.lt.s32.totalorder %s1989_s17, %s1989_s17 }
  0x1f   : > { %p1992_p7 = pnand %p1990_p3, %p1980_p0  ;;  %p1999_p12 = por %p1998_p10, %p1997_p9 }
  0x21   : > { %p1993_p8 = pneg %p1992_p7 }
  0x23   : > { %p2000_p1 = pnand %p1999_p12, %p1993_p8 }
  0x25   : > { %2003 = shalt.err (!%p2000_p1)
}
  0x26   : > { %s2162_s18 = smov 64   ;;  %s2163_s19 = smov 4  }
  0x27   : > { %1848 = dma.hbm_to_vmem [thread:$0]  (!%p2282_p2), %s2785_s4, 1024, %s222_s13, [#allocation9], %s2162_s18, %s2162_s18, %s2163_s19  }
  0x28   : > { %s2015_s28 = scalar_lea.vmem %s206_s16, 2048  ;;  %p2023_p12 = scmp.lt.s32.totalorder %s206_s16, %s206_s16 }
  0x29   : > { %p2016_p3 = scmp.ne.s32.totalorder %s206_s16, %s2015_s28  ;;  %p2024_p8 = scmp.lt.s32.totalorder %s2015_s28, %s2015_s28 }
  0x2b   : > { %p2018_p7 = pnand %p2016_p3, %p1980_p0  ;;  %p2025_p10 = por %p2024_p8, %p2023_p12 }
  0x2d   : > { %p2019_p9 = pneg %p2018_p7 }
  0x2f   : > { %p2026_p1 = pnand %p2025_p10, %p2019_p9 }
  0x31   : > { %2029 = shalt.err (!%p2026_p1)
}
  0x32   : > { %s2164_s29 = smov 128   ;;  %s2165_s12 = smov 8  }
  0x33   : > { %s2800_s2 = sld [smem:[#allocation21_spill]]  ;;  %s2166_s13 = smov [#allocation10]  }
  0x34   : > { %s234_s20 = sshll.u32 %s2166_s13, 4  ;;  %s235_s20 = int_to_ptr.vmem [resolvable:$true] %s234_s20 }
  0x35   : > { %s2041_s26 = scalar_lea.vmem %s235_s20, 2048  ;;  %p2049_p9 = scmp.lt.s32.totalorder %s235_s20, %s235_s20 }
  0x36   : > { %p2042_p3 = scmp.ne.s32.totalorder %s235_s20, %s2041_s26  ;;  %p2050_p8 = scmp.lt.s32.totalorder %s2041_s26, %s2041_s26 }
  0x38   : > { %p2044_p7 = pnand %p2042_p3, %p1980_p0  ;;  %p2051_p10 = por %p2050_p8, %p2049_p9 }
  0x39   : > { %1845 = dma.hbm_to_vmem [thread:$0]  (!%p2282_p2), %s2800_s2, 2048, %s206_s16, [#allocation6], %s2164_s29, %s2164_s29, %s2165_s12  }
  0x3a   : > { %p2045_p12 = pneg %p2044_p7 }
  0x3c   : > { %p2052_p1 = pnand %p2051_p10, %p2045_p12 }
  0x3e   : > { %2055 = shalt.err (!%p2052_p1)
}
  0x3f   : > { %1851 = dma.hbm_to_vmem [thread:$0]  (!%p2282_p2), %s2786_s5, 2048, %s235_s20, [#allocation9], %s2162_s18, %s2162_s18, %s2163_s19  }
  0x40   : > { %p1647_p4 = scmp.ge.s32.totalorder %s2158_s24, 4 }
  0x41   : > { %s2320_s29 = sand.u32 (!%p1647_p4), 1, %s2154_s23   ;;  %s2791_s12 = sshll.u32 (!%p1647_p4), %s2158_s24, 8 }
  0x42   : > { %244 = sbr.rel (%p1647_p4) target bundleno = 109 (0x6d), region = 32  ;;  %s1648_s14 = sshll.u32 (!%p1647_p4), %s2320_s29, 4 }
  0x43   : > { %s2801_s0 = sld [smem:[#allocation20_spill]] (!%p1647_p4)  ;;  %s252_s18 = scalar_lea.vmem (!%p1647_p4), [#allocation2], %s1648_s14 }
  0x44   : > { %s259_s19 = sshll.u32 (!%p1647_p4), %s252_s18, 4  ;;  %s249_s20 = scalar_lea.sflag (!%p1647_p4), [#allocation3], %s2320_s29  ;;  %s2331_s19 = int_to_ptr.vmem [resolvable:$true] %s259_s19 }
  0x49   : > { %s2329_s13 = scalar_lea.hbm %s2801_s0, %s2791_s12  ;;  %s2060_s2 = scalar_lea.hbm %s2801_s0, 1024 }
  0x4a   : > { %s2056_s26 = scalar_lea.hbm %s2329_s13, 256  ;;  %p2061_p3 = scmp.lt.s32.totalorder %s2329_s13, %s2801_s0 }
  0x4b   : > { %p2057_p4 = scmp.ne.s32.totalorder %s2329_s13, %s2056_s26  ;;  %p2062_p7 = scmp.lt.s32.totalorder %s2060_s2, %s2056_s26 }
  0x4d   : > { %p2058_p2 = pnand %p2057_p4, %p2253_p5  ;;  %p2063_p12 = por %p2062_p7, %p2061_p3 }
  0x4f   : > { %p2059_p0 = pneg %p2058_p2 }
  0x51   : > { %p2064_p9 = pnand %p2063_p12, %p2059_p0 }
  0x53   : > { %2067 = shalt.err (!%p2064_p9)
}
  0x54   : > { %s2068_s14 = scalar_lea.vmem %s2331_s19, 256  ;;  %s2167_s18 = smov [#allocation2]  }
  0x55   : > { %p2069_p8 = scmp.ne.s32.totalorder %s2331_s19, %s2068_s14  ;;  %s2072_s16 = sshll.u32 %s2167_s18, 4  ;;  %s2073_s16 = int_to_ptr.vmem [resolvable:$false] %s2072_s16 }
  0x56   : > { %s2074_s28 = scalar_lea.vmem %s2073_s16, 512  ;;  %p2075_p4 = scmp.lt.s32.totalorder %s2331_s19, %s2073_s16 }
  0x57   : > { %p2070_p10 = pnand %p2069_p8, %p2253_p5  ;;  %p2076_p2 = scmp.lt.s32.totalorder %s2074_s28, %s2068_s14 }
  0x59   : > { %p2071_p1 = pneg %p2070_p10  ;;  %p2077_p11 = por %p2076_p2, %p2075_p4 }
  0x5b   : > { %p2078_p6 = pnand %p2077_p11, %p2071_p1 }
  0x5d   : > { %2081 = shalt.err (!%p2078_p6)
}
  0x5e   : > { %s2168_s2 = smov 64   ;;  %s2169_s26 = smov 4  }
  0x5f   : > { %1823 = dma.hbm_to_vmem [thread:$0]  (%p2253_p5), %s2329_s13, 256, %s2331_s19, %s249_s20, %s2168_s2, %s2168_s2, %s2169_s26  }
  0x60   : > { %s269_s15 = sand.u32 1, %s2158_s24   ;;  %s1651_s17 = sshll.u32 %s2320_s29, 7 }
  0x61   : > { %s1824_s14 = scalar_select %p2253_p5, [#allocation0], [#allocation14] }
  0x62   : > { %s273_s18 = scalar_lea.vmem [#allocation5], %s1651_s17  ;;  %s2170_s12 = smov 1024  }
  0x63   : > { %s292_s16 = sshll.u32 %s273_s18, 4  ;;  %s284_s28 = sld [smem:[%s1824_s14]]   ;;  %s293_s16 = int_to_ptr.vmem [resolvable:$true] %s292_s16 }
  0x64   : > { %1825 = sst [smem:[#allocation13]] (%p2253_p5), %s2170_s12  ;;  %s2171_s13 = smov 256  }
  0x65   : > { %1826 = sst [smem:[#allocation13 + $0x1]] (%p2253_p5), %s2171_s13  ;;  %s2802_s19 = sshll.u32 %s2158_s24, 8 }
  0x66   : > { %s279_s26 = scalar_lea.hbm %s2782_s1, %s2802_s19  ;;  %s2172_s0 = smov 4  }
  0x67   : > { %1827 = sst [smem:[#allocation13 + $0x2]] (%p2253_p5), %s2172_s0  ;;  %s2173_s29 = smov 64  }
  0x68   : > { %1828 = sst [smem:[#allocation13 + $0x3]] (%p2253_p5), %s2173_s29  ;;  %s270_s14 = scalar_lea.sflag [#allocation6], %s269_s15 }
  0x69   : > { %1829 = sst [smem:[#allocation13 + $0x4]] (%p2253_p5), %s2173_s29  ;;  %s1654_s17 = sshll.u32 %s284_s28, 26 }
  0x6a   : > { %1830 = sst [smem:[#allocation13 + $0x5]] (%p2253_p5), %s2172_s0  ;;  %s1655_s12 = sadd.s32 134217728, %s1654_s17 }
  0x6b   : > { %s2174_s18 = smov 131072  }
  0x6c   : > { %1831 = dma.general (%p2253_p5), %s279_s26, 2048, %s293_s16, %s270_s14, %s2174_s18, [#allocation13], %s1655_s12, 0  }
  0x6d PF: > { %317 = sbr.rel (%p2274_p13) target bundleno = 689 (0x2b1), region = 44  ;;  %s2382_s13 = sand.u32 (!%p2274_p13), 1, %s2150_s22  }
  0x6e   : > { %s1657_s19 = sshll.u32 (!%p2274_p13), %s2382_s13, 4  ;;  %s320_s20 = scalar_lea.sflag (!%p2274_p13), [#allocation3], %s2382_s13 }
  0x6f   : > { %s2386_s28 = scalar_lea.vmem (!%p2274_p13), [#allocation2], %s1657_s19  ;;  %p2803_p6 = scmp.ne.s32.totalorder (!%p2274_p13), %s2795_s8, 0 }
  0x72   : > { %2125 = dma.done.wait (%p2803_p6), %s320_s20, 256  }
  0x73   : > { %2127 = vsyncadd (%p2803_p6), %s320_s20, 4294967040  ;;  %s328_s0 = sand.u32 1, %s2235_s25   ;;  %s1658_s7 = sshll.u32 %s2382_s13, 7 }
  0x74   : > { %s329_s11 = scalar_lea.sflag [#allocation6], %s328_s0  ;;  %s2394_s15 = scalar_lea.vmem [#allocation5], %s1658_s7 }
  0x75   : > { %2129 = dma.done.wait (%p2803_p6), %s329_s11, 2048  }
  0x76   : > { %2131 = vsyncadd (%p2803_p6), %s329_s11, 4294965248  ;;  %p2804_p5 = scmp.eq.s32.totalorder %s2235_s25, 0 }
  0x78   : > { %2133 = dma.done.wait (%p2804_p5), [#allocation6], 2048   ;;  %p2805_p11 = pmov %p2804_p5 }
  0x79   : > { %p2806_p13 = pmov %p2804_p5 }
  0x7a   : > { %2135 = vsyncadd (%p2805_p11), [#allocation6], 4294965248 }
  0x7b   : > { %2137 = dma.done.wait (%p2806_p13), [#allocation9], 3072   ;;  %p2807_p0 = pmov %p2804_p5 }
  0x7c   : > { %v2175_v0 = vmov 0   ;;  %v2410_v1 = vld [vmem:[#allocation7 + $0x74] ss:$8 sps:$4 sm:$0xff]   ;;  %v2412_v2 = vld [vmem:[#allocation7 + $0x70] ss:$8 sps:$4 sm:$0xff]   ;;  %v1936_v17 = vld [vmem:[%s2394_s15] sm:$0xff]  }
  0x7d   : > { %2139 = vsyncadd (%p2807_p0), [#allocation9], 4294964224  ;;  %538 = vmatprep.mubr.bf16.mxu0 %v2175_v0  ;;  %624 = vmatprep.mubr.bf16.mxu1 %v2175_v0  ;;  %v2416_v3 = vld [vmem:[#allocation7 + $0x64] ss:$8 sps:$4 sm:$0xff]   ;;  %v2420_v4 = vld [vmem:[#allocation7 + $0x60] ss:$8 sps:$4 sm:$0xff]  }
  0x7e   : > { %506 = vmatprep.subr.bf16.mxu0 %v2410_v1  ;;  %592 = vmatprep.subr.bf16.mxu1 %v2410_v1  ;;  %v2424_v5 = vld [vmem:[#allocation7 + $0x54] ss:$8 sps:$4 sm:$0xff]   ;;  %v2428_v6 = vld [vmem:[#allocation7 + $0x50] ss:$8 sps:$4 sm:$0xff]   ;;  %v2432_v7 = vld [vmem:[#allocation7 + $0x44] ss:$8 sps:$4 sm:$0xff]  }
  0x7f   : > { %507 = vmatpush1.bf16.msra.mxu0 %v2412_v2  ;;  %593 = vmatpush1.bf16.msra.mxu1 %v2412_v2  ;;  %v2436_v8 = vld [vmem:[#allocation7 + $0x40] ss:$8 sps:$4 sm:$0xff]   ;;  %v2440_v9 = vld [vmem:[#allocation7 + $0x34] ss:$8 sps:$4 sm:$0xff]   ;;  %v2444_v10 = vld [vmem:[#allocation7 + $0x30] ss:$8 sps:$4 sm:$0xff]  }
  0x80   : > { %508 = vmatprep.subr.bf16.mxu0 %v2416_v3  ;;  %594 = vmatprep.subr.bf16.mxu1 %v2416_v3  ;;  %v2448_v11 = vld [vmem:[#allocation7 + $0x24] ss:$8 sps:$4 sm:$0xff]   ;;  %v2452_v12 = vld [vmem:[#allocation7 + $0x20] ss:$8 sps:$4 sm:$0xff]   ;;  %v2456_v13 = vld [vmem:[#allocation7 + $0x14] ss:$8 sps:$4 sm:$0xff]  }
  0x81   : > { %v2460_v14 = vld [vmem:[#allocation7 + $0x10] ss:$8 sps:$4 sm:$0xff]   ;;  %v2464_v15 = vld [vmem:[#allocation7 + $0x4] ss:$8 sps:$4 sm:$0xff]   ;;  %v2466_v16 = vld [vmem:[#allocation7] ss:$8 sps:$4 sm:$0xff]  }
  0x82   : > { %v1937_v18 = vld [vmem:[%s2394_s15 + $0x10] sm:$0xff]   ;;  %v1938_v19 = vld [vmem:[%s2394_s15 + $0x8] sm:$0xff]   ;;  %v1939_v20 = vld [vmem:[%s2394_s15 + $0x18] sm:$0xff]   ;;  %s1662_s2 = sshll.u32 %s2382_s13, 6  ;;  %s1758_s17 = sshll.u32 %s2235_s25, 10 }
  0x83   : > { %509 = vmatpush1.bf16.msra.mxu0 %v2420_v4  ;;  %595 = vmatpush1.bf16.msra.mxu1 %v2420_v4  ;;  %v1940_v21 = vld [vmem:[%s2394_s15 + $0x20] sm:$0xff]   ;;  %v1941_v22 = vld [vmem:[%s2394_s15 + $0x30] sm:$0xff]   ;;  %v1942_v23 = vld [vmem:[%s2394_s15 + $0x28] sm:$0xff]   ;;  %s2722_s26 = scalar_lea.vmem [#allocation11], %s1662_s2  ;;  %s2738_s18 = scalar_lea.hbm %s2787_s6, %s1758_s17 }
  0x84   : > { %510 = vmatprep.subr.bf16.mxu0 %v2424_v5  ;;  %596 = vmatprep.subr.bf16.mxu1 %v2424_v5  ;;  %v1943_v24 = vld [vmem:[%s2394_s15 + $0x38] sm:$0xff]   ;;  %v1944_v25 = vld [vmem:[%s2394_s15 + $0x40] sm:$0xff]   ;;  %v1945_v26 = vld [vmem:[%s2394_s15 + $0x50] sm:$0xff]   ;;  %s1518_s29 = sshll.u32 %s2722_s26, 4  ;;  %s1504_s19 = scalar_lea.sflag [#allocation4], %s2382_s13  ;;  %s2732_s29 = int_to_ptr.vmem [resolvable:$true] %s1518_s29 }
  0x85   : > { %v1946_v27 = vld [vmem:[%s2394_s15 + $0x48] sm:$0xff]   ;;  %v1947_v28 = vld [vmem:[%s2394_s15 + $0x58] sm:$0xff]   ;;  %v1948_v29 = vld [vmem:[%s2394_s15 + $0x60] sm:$0xff]   ;;  %s2082_s20 = scalar_lea.vmem %s2732_s29, 1024  ;;  %p2808_p7 = scmp.ne.s32.totalorder %s2796_s9, 0 }
  0x86   : > { %v1949_v30 = vld [vmem:[%s2394_s15 + $0x70] sm:$0xff]   ;;  %v1950_v31 = vld [vmem:[%s2394_s15 + $0x68] sm:$0xff]   ;;  %v1951_v32 = vld [vmem:[%s2394_s15 + $0x78] sm:$0xff]   ;;  %p2083_p3 = scmp.ne.s32.totalorder %s2732_s29, %s2082_s20  ;;  %s2176_s25 = smov [#allocation11]  }
  0x87   : > { %511 = vmatpush1.bf16.msra.mxu0 %v2428_v6  ;;  %597 = vmatpush1.bf16.msra.mxu1 %v2428_v6  ;;  %v1952_v33 = vld [vmem:[#allocation10 + $0x78] sm:$0xff]   ;;  %v1955_v36 = vld [vmem:[#allocation10 + $0x70] sm:$0xff]   ;;  %v1958_v39 = vld [vmem:[#allocation10 + $0x68] sm:$0xff]  }
  0x88   : > { %512 = vmatprep.subr.bf16.mxu0 %v2432_v7  ;;  %598 = vmatprep.subr.bf16.mxu1 %v2432_v7  ;;  %v1953_v34 = vld [vmem:[#allocation10 + $0x38] sm:$0xff]   ;;  %v1956_v37 = vld [vmem:[#allocation10 + $0x30] sm:$0xff]   ;;  %v1959_v40 = vld [vmem:[#allocation10 + $0x28] sm:$0xff]   ;;  %p2084_p12 = pnand %p2083_p3, %p2808_p7 }
  0x89   : > { %v1954_v35 = vld [vmem:[#allocation8 + $0x38] sm:$0xff]   ;;  %v1957_v38 = vld [vmem:[#allocation8 + $0x30] sm:$0xff]   ;;  %v1960_v41 = vld [vmem:[#allocation8 + $0x28] sm:$0xff]  }
  0x8a   : > { %v1961_v42 = vld [vmem:[#allocation10 + $0x60] sm:$0xff]   ;;  %v1964_v45 = vld [vmem:[#allocation10 + $0x58] sm:$0xff]   ;;  %v1967_v48 = vld [vmem:[#allocation10 + $0x50] sm:$0xff]   ;;  %p2085_p9 = pneg %p2084_p12 }
  0x8b   : > { %513 = vmatpush1.bf16.msra.mxu0 %v2436_v8  ;;  %599 = vmatpush1.bf16.msra.mxu1 %v2436_v8  ;;  %v1962_v43 = vld [vmem:[#allocation10 + $0x20] sm:$0xff]   ;;  %v1965_v46 = vld [vmem:[#allocation10 + $0x18] sm:$0xff]   ;;  %v1968_v49 = vld [vmem:[#allocation10 + $0x10] sm:$0xff]  }
  0x8c   : > { %514 = vmatprep.subr.bf16.mxu0 %v2440_v9  ;;  %600 = vmatprep.subr.bf16.mxu1 %v2440_v9  ;;  %v1963_v44 = vld [vmem:[#allocation8 + $0x20] sm:$0xff]   ;;  %v1966_v47 = vld [vmem:[#allocation8 + $0x18] sm:$0xff]   ;;  %v1969_v50 = vld [vmem:[#allocation8 + $0x10] sm:$0xff]  }
  0x8d   : > { %v1970_v51 = vld [vmem:[#allocation10 + $0x48] sm:$0xff]   ;;  %v1973_v54 = vld [vmem:[#allocation10 + $0x40] sm:$0xff]  }
  0x8e   : > { %v1971_v52 = vld [vmem:[#allocation10 + $0x8] sm:$0xff]   ;;  %v1974_v55 = vld [vmem:[#allocation10] sm:$0xff]  }
  0x8f   : > { %515 = vmatpush1.bf16.msra.mxu0 %v2444_v10  ;;  %601 = vmatpush1.bf16.msra.mxu1 %v2444_v10  ;;  %v1972_v53 = vld [vmem:[#allocation8 + $0x8] sm:$0xff]   ;;  %v1975_v56 = vld [vmem:[#allocation8] sm:$0xff]  }
  0x90   : > { %516 = vmatprep.subr.bf16.mxu0 %v2448_v11  ;;  %602 = vmatprep.subr.bf16.mxu1 %v2448_v11  ;;  %v1976_v57 = vld [vmem:[%s2386_s28] sm:$0xff]   ;;  %v1977_v58 = vld [vmem:[%s2386_s28 + $0x8] sm:$0xff]   ;;  %s2086_s28 = sshll.u32 %s2176_s25, 4  ;;  %s2087_s28 = int_to_ptr.vmem [resolvable:$false] %s2086_s28 }
  0x91   : > { %s2088_s0 = scalar_lea.vmem %s2087_s28, 2048  ;;  %p2089_p8 = scmp.lt.s32.totalorder %s2732_s29, %s2087_s28 }
  0x92   : > { %p2090_p10 = scmp.lt.s32.totalorder %s2088_s0, %s2082_s20 }
  0x93   : > { %517 = vmatpush1.bf16.msra.mxu0 %v2452_v12  ;;  %603 = vmatpush1.bf16.msra.mxu1 %v2452_v12 }
  0x94   : > { %518 = vmatprep.subr.bf16.mxu0 %v2456_v13  ;;  %604 = vmatprep.subr.bf16.mxu1 %v2456_v13  ;;  %p2091_p1 = por %p2090_p10, %p2089_p8 }
  0x96   : > { %p2092_p4 = pnand %p2091_p1, %p2085_p9 }
  0x97   : > { %519 = vmatpush1.bf16.msra.mxu0 %v2460_v14  ;;  %605 = vmatpush1.bf16.msra.mxu1 %v2460_v14 }
  0x98   : > { %520 = vmatprep.subr.bf16.mxu0 %v2464_v15  ;;  %606 = vmatprep.subr.bf16.mxu1 %v2464_v15 }
  0x9b   : > { %521 = vmatpush1.bf16.msra.mxu0 %v2466_v16  ;;  %607 = vmatpush1.bf16.msra.mxu1 %v2466_v16 }
  0x9c   : > { %678 = vmatprep.subr.bf16.mxu0 %v2410_v1  ;;  %764 = vmatprep.subr.bf16.mxu1 %v2410_v1 }
  0x9e   : > { %539 = vmatmul.mubr.bf16.vlgmr.msra.gmra.mxu0 %v1936_v17  ;;  %625 = vmatmul.mubr.bf16.vlgmr.msra.gmra.mxu1 %v1937_v18 }
  0x9f   : > { %679 = vmatpush1.bf16.msra.mxu0 %v2412_v2  ;;  %765 = vmatpush1.bf16.msra.mxu1 %v2412_v2 }
  0xa0   : > { %680 = vmatprep.subr.bf16.mxu0 %v2416_v3  ;;  %766 = vmatprep.subr.bf16.mxu1 %v2416_v3 }
  0xa1   : > { %548 = vmatprep.mubr.bf16.mxu0 %v2175_v0  ;;  %634 = vmatprep.mubr.bf16.mxu1 %v2175_v0 }
  0xa3   : > { %681 = vmatpush1.bf16.msra.mxu0 %v2420_v4  ;;  %767 = vmatpush1.bf16.msra.mxu1 %v2420_v4 }
  0xa4   : > { %682 = vmatprep.subr.bf16.mxu0 %v2424_v5  ;;  %768 = vmatprep.subr.bf16.mxu1 %v2424_v5 }
  0xa6   : > { %549 = vmatmul.mubr.bf16.gmra.mxu0 %v1938_v19  ;;  %635 = vmatmul.mubr.bf16.gmra.mxu1 %v1939_v20 }
  0xa7   : > { %683 = vmatpush1.bf16.msra.mxu0 %v2428_v6  ;;  %769 = vmatpush1.bf16.msra.mxu1 %v2428_v6 }
  0xa8   : > { %684 = vmatprep.subr.bf16.mxu0 %v2432_v7  ;;  %770 = vmatprep.subr.bf16.mxu1 %v2432_v7 }
  0xa9   : > { %710 = vmatprep.mubr.bf16.mxu0 %v2175_v0  ;;  %796 = vmatprep.mubr.bf16.mxu1 %v2175_v0 }
  0xab   : > { %685 = vmatpush1.bf16.msra.mxu0 %v2436_v8  ;;  %771 = vmatpush1.bf16.msra.mxu1 %v2436_v8 }
  0xac   : > { %686 = vmatprep.subr.bf16.mxu0 %v2440_v9  ;;  %772 = vmatprep.subr.bf16.mxu1 %v2440_v9 }
  0xaf   : > { %687 = vmatpush1.bf16.msra.mxu0 %v2444_v10  ;;  %773 = vmatpush1.bf16.msra.mxu1 %v2444_v10 }
  0xb0   : > { %688 = vmatprep.subr.bf16.mxu0 %v2448_v11  ;;  %774 = vmatprep.subr.bf16.mxu1 %v2448_v11 }
  0xb3   : > { %689 = vmatpush1.bf16.msra.mxu0 %v2452_v12  ;;  %775 = vmatpush1.bf16.msra.mxu1 %v2452_v12 }
  0xb4   : > { %690 = vmatprep.subr.bf16.mxu0 %v2456_v13  ;;  %776 = vmatprep.subr.bf16.mxu1 %v2456_v13 }
  0xb7   : > { %691 = vmatpush1.bf16.msra.mxu0 %v2460_v14  ;;  %777 = vmatpush1.bf16.msra.mxu1 %v2460_v14 }
  0xb8   : > { %692 = vmatprep.subr.bf16.mxu0 %v2464_v15  ;;  %778 = vmatprep.subr.bf16.mxu1 %v2464_v15 }
  0xbb   : > { %693 = vmatpush1.bf16.msra.mxu0 %v2466_v16  ;;  %779 = vmatpush1.bf16.msra.mxu1 %v2466_v16 }
  0xbc   : > { %850 = vmatprep.subr.bf16.mxu0 %v2410_v1  ;;  %936 = vmatprep.subr.bf16.mxu1 %v2410_v1 }
  0xbe   : > { %711 = vmatmul.mubr.bf16.vlgmr.msra.gmra.mxu0 %v1940_v21  ;;  %797 = vmatmul.mubr.bf16.vlgmr.msra.gmra.mxu1 %v1941_v22 }
  0xbf   : > { %851 = vmatpush1.bf16.msra.mxu0 %v2412_v2  ;;  %937 = vmatpush1.bf16.msra.mxu1 %v2412_v2 }
  0xc0   : > { %852 = vmatprep.subr.bf16.mxu0 %v2416_v3  ;;  %938 = vmatprep.subr.bf16.mxu1 %v2416_v3 }
  0xc1   : > { %720 = vmatprep.mubr.bf16.mxu0 %v2175_v0  ;;  %806 = vmatprep.mubr.bf16.mxu1 %v2175_v0 }
  0xc3   : > { %853 = vmatpush1.bf16.msra.mxu0 %v2420_v4  ;;  %939 = vmatpush1.bf16.msra.mxu1 %v2420_v4 }
  0xc4   : > { %854 = vmatprep.subr.bf16.mxu0 %v2424_v5  ;;  %940 = vmatprep.subr.bf16.mxu1 %v2424_v5 }
  0xc6   : > { %721 = vmatmul.mubr.bf16.gmra.mxu0 %v1942_v23  ;;  %807 = vmatmul.mubr.bf16.gmra.mxu1 %v1943_v24 }
  0xc7   : > { %855 = vmatpush1.bf16.msra.mxu0 %v2428_v6  ;;  %941 = vmatpush1.bf16.msra.mxu1 %v2428_v6 }
  0xc8   : > { %856 = vmatprep.subr.bf16.mxu0 %v2432_v7  ;;  %942 = vmatprep.subr.bf16.mxu1 %v2432_v7 }
  0xc9   : > { %882 = vmatprep.mubr.bf16.mxu0 %v2175_v0  ;;  %968 = vmatprep.mubr.bf16.mxu1 %v2175_v0 }
  0xcb   : > { %857 = vmatpush1.bf16.msra.mxu0 %v2436_v8  ;;  %943 = vmatpush1.bf16.msra.mxu1 %v2436_v8 }
  0xcc   : > { %858 = vmatprep.subr.bf16.mxu0 %v2440_v9  ;;  %944 = vmatprep.subr.bf16.mxu1 %v2440_v9 }
  0xcf   : > { %859 = vmatpush1.bf16.msra.mxu0 %v2444_v10  ;;  %945 = vmatpush1.bf16.msra.mxu1 %v2444_v10 }
  0xd0   : > { %860 = vmatprep.subr.bf16.mxu0 %v2448_v11  ;;  %946 = vmatprep.subr.bf16.mxu1 %v2448_v11 }
  0xd3   : > { %861 = vmatpush1.bf16.msra.mxu0 %v2452_v12  ;;  %947 = vmatpush1.bf16.msra.mxu1 %v2452_v12 }
  0xd4   : > { %862 = vmatprep.subr.bf16.mxu0 %v2456_v13  ;;  %948 = vmatprep.subr.bf16.mxu1 %v2456_v13 }
  0xd7   : > { %863 = vmatpush1.bf16.msra.mxu0 %v2460_v14  ;;  %949 = vmatpush1.bf16.msra.mxu1 %v2460_v14 }
  0xd8   : > { %864 = vmatprep.subr.bf16.mxu0 %v2464_v15  ;;  %950 = vmatprep.subr.bf16.mxu1 %v2464_v15 }
  0xdb   : > { %865 = vmatpush1.bf16.msra.mxu0 %v2466_v16  ;;  %951 = vmatpush1.bf16.msra.mxu1 %v2466_v16 }
  0xdc   : > { %1022 = vmatprep.subr.bf16.mxu0 %v2410_v1  ;;  %1108 = vmatprep.subr.bf16.mxu1 %v2410_v1 }
  0xde   : > { %883 = vmatmul.mubr.bf16.vlgmr.msra.gmra.mxu0 %v1944_v25  ;;  %969 = vmatmul.mubr.bf16.vlgmr.msra.gmra.mxu1 %v1945_v26  ;;  %v382_v25 = vld [vmem:[%s2784_s3] sm:$0x3] }
  0xdf   : > { %1023 = vmatpush1.bf16.msra.mxu0 %v2412_v2  ;;  %1109 = vmatpush1.bf16.msra.mxu1 %v2412_v2 }
  0xe0   : > { %1024 = vmatprep.subr.bf16.mxu0 %v2416_v3  ;;  %1110 = vmatprep.subr.bf16.mxu1 %v2416_v3 }
  0xe1   : > { %892 = vmatprep.mubr.bf16.mxu0 %v2175_v0  ;;  %978 = vmatprep.mubr.bf16.mxu1 %v2175_v0 }
  0xe3   : > { %1025 = vmatpush1.bf16.msra.mxu0 %v2420_v4  ;;  %1111 = vmatpush1.bf16.msra.mxu1 %v2420_v4 }
  0xe4   : > { %1026 = vmatprep.subr.bf16.mxu0 %v2424_v5  ;;  %1112 = vmatprep.subr.bf16.mxu1 %v2424_v5 }
  0xe6   : > { %893 = vmatmul.mubr.bf16.gmra.mxu0 %v1946_v27  ;;  %979 = vmatmul.mubr.bf16.gmra.mxu1 %v1947_v28 }
  0xe7   : > { %1027 = vmatpush1.bf16.msra.mxu0 %v2428_v6  ;;  %1113 = vmatpush1.bf16.msra.mxu1 %v2428_v6 }
  0xe8   : > { %1028 = vmatprep.subr.bf16.mxu0 %v2432_v7  ;;  %1114 = vmatprep.subr.bf16.mxu1 %v2432_v7 }
  0xe9   : > { %1054 = vmatprep.mubr.bf16.mxu0 %v2175_v0  ;;  %1140 = vmatprep.mubr.bf16.mxu1 %v2175_v0 }
  0xeb   : > { %1029 = vmatpush1.bf16.msra.mxu0 %v2436_v8  ;;  %1115 = vmatpush1.bf16.msra.mxu1 %v2436_v8 }
  0xec   : > { %1030 = vmatprep.subr.bf16.mxu0 %v2440_v9  ;;  %1116 = vmatprep.subr.bf16.mxu1 %v2440_v9 }
  0xef   : > { %1031 = vmatpush1.bf16.msra.mxu0 %v2444_v10  ;;  %1117 = vmatpush1.bf16.msra.mxu1 %v2444_v10 }
  0xf0   : > { %1032 = vmatprep.subr.bf16.mxu0 %v2448_v11  ;;  %1118 = vmatprep.subr.bf16.mxu1 %v2448_v11 }
  0xf3   : > { %1033 = vmatpush1.bf16.msra.mxu0 %v2452_v12  ;;  %1119 = vmatpush1.bf16.msra.mxu1 %v2452_v12 }
  0xf4   : > { %1034 = vmatprep.subr.bf16.mxu0 %v2456_v13  ;;  %1120 = vmatprep.subr.bf16.mxu1 %v2456_v13 }
  0xf7   : > { %1035 = vmatpush1.bf16.msra.mxu0 %v2460_v14  ;;  %1121 = vmatpush1.bf16.msra.mxu1 %v2460_v14 }
  0xf8   : > { %1036 = vmatprep.subr.bf16.mxu0 %v2464_v15  ;;  %1122 = vmatprep.subr.bf16.mxu1 %v2464_v15 }
  0xfb   : > { %1037 = vmatpush1.bf16.msra.mxu0 %v2466_v16  ;;  %1123 = vmatpush1.bf16.msra.mxu1 %v2466_v16  ;;  %v404_v16 = vlaneseq }
  0xfc   : > { %1769 = vmatprep.subr.bf16.mxu1 %v1952_v33  ;;  %1797 = vmatprep.subr.bf16.mxu0 %v1954_v35 }
  0xfd   : > { %v405_v19 = vshrl.u32 %v404_v16, 7 }
  0xfe   : > { %1055 = vmatmul.mubr.bf16.vlgmr.msra.gmra.mxu0 %v1948_v29  ;;  %1141 = vmatmul.mubr.bf16.vlgmr.msra.gmra.mxu1 %v1949_v30 }
  0xff   : > { %1064 = vmatprep.mubr.bf16.mxu0 %v2175_v0  ;;  %1150 = vmatprep.mubr.bf16.mxu1 %v2175_v0  ;;  %v406_v23 = vsub.s32 0, %v405_v19  ;;  %v410_v26 = vsub.s32 1, %v405_v19 }
 0x100   : > { %1770 = vmatpush3.bf16.msra.mxu1 %v1953_v34  ;;  %1798 = vmatpush3.bf16.msra.mxu0 %v1954_v35 }
 0x101   : > { %1771 = vmatprep.subr.bf16.mxu1 %v1955_v36  ;;  %1799 = vmatprep.subr.bf16.mxu0 %v1957_v38  ;;  %v2617_v28 = vrot.slane %v382_v25, %v406_v23  ;;  %v2621_v30 = vrot.slane %v382_v25, %v410_v26 }
 0x104   : > { %1772 = vmatpush3.bf16.msra.mxu1 %v1956_v37  ;;  %1800 = vmatpush3.bf16.msra.mxu0 %v1957_v38 }
 0x105   : > { %1773 = vmatprep.subr.bf16.mxu1 %v1958_v39  ;;  %1801 = vmatprep.subr.bf16.mxu0 %v1960_v41 }
 0x106   : > { %1065 = vmatmul.mubr.bf16.gmra.mxu0 %v1950_v31  ;;  %1151 = vmatmul.mubr.bf16.gmra.mxu1 %v1951_v32 }
 0x107   : > { %1813 = vmatprep.mubr.bf16.mxu0 %v1976_v57 }
 0x108   : > { %1774 = vmatpush3.bf16.msra.mxu1 %v1959_v40  ;;  %1802 = vmatpush3.bf16.msra.mxu0 %v1960_v41 }
 0x109   : > { %1775 = vmatprep.subr.bf16.mxu1 %v1961_v42  ;;  %1803 = vmatprep.subr.bf16.mxu0 %v1963_v44 }
 0x10c   : > { %1776 = vmatpush3.bf16.msra.mxu1 %v1962_v43  ;;  %1804 = vmatpush3.bf16.msra.mxu0 %v1963_v44 }
 0x10d   : > { %1777 = vmatprep.subr.bf16.mxu1 %v1964_v45  ;;  %1805 = vmatprep.subr.bf16.mxu0 %v1966_v47 }
 0x110   : > { %1778 = vmatpush3.bf16.msra.mxu1 %v1965_v46  ;;  %1806 = vmatpush3.bf16.msra.mxu0 %v1966_v47 }
 0x111   : > { %1779 = vmatprep.subr.bf16.mxu1 %v1967_v48  ;;  %1807 = vmatprep.subr.bf16.mxu0 %v1969_v50 }
 0x114   : > { %1780 = vmatpush3.bf16.msra.mxu1 %v1968_v49  ;;  %1808 = vmatpush3.bf16.msra.mxu0 %v1969_v50 }
 0x115   : > { %1781 = vmatprep.subr.bf16.mxu1 %v1970_v51  ;;  %1809 = vmatprep.subr.bf16.mxu0 %v1972_v53 }
 0x118   : > { %1782 = vmatpush3.bf16.msra.mxu1 %v1971_v52  ;;  %1810 = vmatpush3.bf16.msra.mxu0 %v1972_v53 }
 0x119   : > { %1783 = vmatprep.subr.bf16.mxu1 %v1973_v54  ;;  %1811 = vmatprep.subr.bf16.mxu0 %v1975_v56 }
 0x11c   : > { %1784 = vmatpush3.bf16.msra.mxu1 %v1974_v55  ;;  %1812 = vmatpush3.bf16.msra.mxu0 %v1975_v56 }
 0x11f   : > { %1814 = vmatmul.mubr.bf16.vlgmr.msra.gmra.mxu0 %v1977_v58 }
 0x15e   : > { %v540_v59 = vpop.f32.mrf.mxu0  ;;  %v626_v60 = vpop.f32.mrf.mxu1 }
 0x15f   : > { %v541_v32 = vadd.f32 %v540_v59, %v2617_v28  ;;  %v627_v33 = vadd.f32 %v626_v60, %v2617_v28 }
 0x160   : > { %v542_v61 = vpop.f32.mrf.mxu0  ;;  %v628_v62 = vpop.f32.mrf.mxu1 }
 0x161   : > { %v543_v35 = vadd.f32 %v542_v61, %v2621_v30  ;;  %v629_v36 = vadd.f32 %v628_v62, %v2621_v30  ;;  %v559_v39 = vmax.f32 %v541_v32, 0.0  ;;  %v645_v40 = vmax.f32 %v627_v33, 0.0 }
 0x162   : > { %v544_v63 = vpop.f32.mrf.mxu0  ;;  %v630_v0 = vpop.f32.mrf.mxu1 }
 0x163   : > { %v560_v42 = vmax.f32 %v543_v35, 0.0  ;;  %v646_v43 = vmax.f32 %v629_v36, 0.0  ;;  %v545_v44 = vadd.f32 %v544_v63, %v2617_v28  ;;  %v631_v45 = vadd.f32 %v630_v0, %v2617_v28 }
 0x164   : > { %v546_v1 = vpop.f32.mrf.mxu0  ;;  %v632_v3 = vpop.f32.mrf.mxu1  ;;  %v653_v47 = vadd.f32 %v645_v40, %v559_v39 }
 0x165   : > { %v654_v50 = vadd.f32 %v646_v43, %v560_v42  ;;  %v547_v51 = vadd.f32 %v546_v1, %v2621_v30  ;;  %v633_v52 = vadd.f32 %v632_v3, %v2621_v30  ;;  %v561_v54 = vmax.f32 %v545_v44, 0.0 }
 0x166   : > { %v550_v2 = vpop.f32.mrf.mxu0  ;;  %v636_v4 = vpop.f32.mrf.mxu1  ;;  %v647_v55 = vmax.f32 %v631_v45, 0.0 }
 0x167   : > { %v551_v53 = vadd.f32 %v550_v2, %v2617_v28  ;;  %v637_v56 = vadd.f32 %v636_v4, %v2617_v28  ;;  %v562_v4 = vmax.f32 %v547_v51, 0.0 }
 0x168   : > { %v552_v5 = vpop.f32.mrf.mxu0  ;;  %v638_v6 = vpop.f32.mrf.mxu1  ;;  %v655_v36 = vadd.f32 %v647_v55, %v561_v54 }
 0x169   : > { %v553_v59 = vadd.f32 %v552_v5, %v2621_v30  ;;  %v639_v60 = vadd.f32 %v638_v6, %v2621_v30  ;;  %v649_v16 = vmax.f32 %v637_v56, 0.0 }
 0x16a   : > { %v554_v7 = vpop.f32.mrf.mxu0  ;;  %v640_v8 = vpop.f32.mrf.mxu1 }
 0x16b   : > { %v555_v61 = vadd.f32 %v554_v7, %v2617_v28  ;;  %v641_v62 = vadd.f32 %v640_v8, %v2617_v28  ;;  %v650_v23 = vmax.f32 %v639_v60, 0.0 }
 0x16c   : > { %v556_v9 = vpop.f32.mrf.mxu0  ;;  %v642_v11 = vpop.f32.mrf.mxu1 }
 0x16d   : > { %v557_v63 = vadd.f32 %v556_v9, %v2621_v30  ;;  %v643_v0 = vadd.f32 %v642_v11, %v2621_v30  ;;  %v564_v9 = vmax.f32 %v553_v59, 0.0  ;;  %v565_v11 = vmax.f32 %v555_v61, 0.0 }
 0x16e   : > { %v651_v25 = vmax.f32 %v641_v62, 0.0 }
 0x16f   : > { %v566_v26 = vmax.f32 %v557_v63, 0.0  ;;  %v658_v51 = vadd.f32 %v650_v23, %v564_v9 }
 0x17e   : > { %v712_v10 = vpop.f32.mrf.mxu0  ;;  %v798_v12 = vpop.f32.mrf.mxu1 }
 0x17f   : > { %v713_v48 = vadd.f32 %v712_v10, %v2617_v28  ;;  %v799_v2 = vadd.f32 %v798_v12, %v2617_v28  ;;  %v648_v10 = vmax.f32 %v633_v52, 0.0  ;;  %v652_v12 = vmax.f32 %v643_v0, 0.0 }
 0x180   : > { %v714_v13 = vpop.f32.mrf.mxu0  ;;  %v800_v14 = vpop.f32.mrf.mxu1  ;;  %v659_v52 = vadd.f32 %v651_v25, %v565_v11 }
 0x181   : > { %v715_v57 = vadd.f32 %v714_v13, %v2621_v30  ;;  %v731_v1 = vmax.f32 %v713_v48, 0.0  ;;  %v563_v13 = vmax.f32 %v551_v53, 0.0  ;;  %v801_v7 = vadd.f32 %v800_v14, %v2621_v30 }
 0x182   : > { %v716_v15 = vpop.f32.mrf.mxu0  ;;  %v2602_v17 = vpop.f32.mrf.mxu1  ;;  %v817_v33 = vmax.f32 %v799_v2, 0.0  ;;  %v656_v45 = vadd.f32 %v648_v10, %v562_v4  ;;  %v660_v53 = vadd.f32 %v652_v12, %v566_v26 }
 0x183   : > { %v717_v5 = vadd.f32 %v716_v15, %v2617_v28  ;;  %v732_v6 = vmax.f32 %v715_v57, 0.0  ;;  %v739_v32 = vadd.f32 %v731_v1, %v653_v47  ;;  %v803_v15 = vadd.f32 %v2602_v17, %v2617_v28 }
 0x184   : > { %v718_v18 = vpop.f32.mrf.mxu0  ;;  %v2604_v20 = vpop.f32.mrf.mxu1  ;;  %v818_v42 = vmax.f32 %v801_v7, 0.0  ;;  %v657_v48 = vadd.f32 %v649_v16, %v563_v13 }
 0x185   : > { %v719_v8 = vadd.f32 %v718_v18, %v2621_v30  ;;  %v733_v39 = vmax.f32 %v717_v5, 0.0  ;;  %v740_v40 = vadd.f32 %v732_v6, %v654_v50  ;;  %v805_v47 = vadd.f32 %v2604_v20, %v2621_v30 }
 0x186   : > { %v2606_v21 = vpop.f32.mrf.mxu0  ;;  %v2608_v22 = vpop.f32.mrf.mxu1  ;;  %v825_v54 = vadd.f32 %v817_v33, %v739_v32  ;;  %v819_v55 = vmax.f32 %v803_v15, 0.0 }
 0x187   : > { %v734_v14 = vmax.f32 %v719_v8, 0.0  ;;  %v723_v18 = vadd.f32 %v2606_v21, %v2617_v28  ;;  %v741_v50 = vadd.f32 %v733_v39, %v655_v36  ;;  %v826_v57 = vadd.f32 %v818_v42, %v740_v40 }
 0x188   : > { %v2610_v24 = vpop.f32.mrf.mxu0  ;;  %v2615_v27 = vpop.f32.mrf.mxu1  ;;  %v809_v20 = vadd.f32 %v2608_v22, %v2617_v28  ;;  %v820_v63 = vmax.f32 %v805_v47, 0.0 }
 0x189   : > { %v725_v17 = vadd.f32 %v2610_v24, %v2621_v30  ;;  %v742_v59 = vadd.f32 %v734_v14, %v656_v45  ;;  %v735_v60 = vmax.f32 %v723_v18, 0.0  ;;  %v811_v24 = vadd.f32 %v2615_v27, %v2621_v30 }
 0x18a   : > { %v2619_v29 = vpop.f32.mrf.mxu0  ;;  %v2623_v31 = vpop.f32.mrf.mxu1  ;;  %v827_v4 = vadd.f32 %v819_v55, %v741_v50 }
 0x18b   : > { %v727_v56 = vadd.f32 %v2619_v29, %v2617_v28  ;;  %v736_v1 = vmax.f32 %v725_v17, 0.0  ;;  %v828_v5 = vadd.f32 %v820_v63, %v742_v59  ;;  %v743_v16 = vadd.f32 %v735_v60, %v657_v48 }
 0x18c   : > { %v2627_v34 = vpop.f32.mrf.mxu0  ;;  %v2631_v37 = vpop.f32.mrf.mxu1  ;;  %v822_v8 = vmax.f32 %v811_v24, 0.0 }
 0x18d   : > { %v729_v21 = vadd.f32 %v2627_v34, %v2621_v30  ;;  %v813_v34 = vadd.f32 %v2623_v31, %v2617_v28  ;;  %v737_v10 = vmax.f32 %v727_v56, 0.0  ;;  %v815_v27 = vadd.f32 %v2631_v37, %v2621_v30 }
 0x18f   : > { %v738_v13 = vmax.f32 %v729_v21, 0.0  ;;  %v823_v23 = vmax.f32 %v813_v34, 0.0  ;;  %v745_v26 = vadd.f32 %v737_v10, %v659_v52  ;;  %v824_v12 = vmax.f32 %v815_v27, 0.0 }
 0x191   : > { %v746_v37 = vadd.f32 %v738_v13, %v660_v53  ;;  %v831_v53 = vadd.f32 %v823_v23, %v745_v26 }
 0x193   : > { %v832_v17 = vadd.f32 %v824_v12, %v746_v37 }
 0x19e   : > { %v2633_v38 = vpop.f32.mrf.mxu0  ;;  %v2635_v41 = vpop.f32.mrf.mxu1 }
 0x19f   : > { %v885_v0 = vadd.f32 %v2633_v38, %v2617_v28  ;;  %v821_v38 = vmax.f32 %v809_v20, 0.0 }
 0x1a0   : > { %v2639_v46 = vpop.f32.mrf.mxu0  ;;  %v2642_v49 = vpop.f32.mrf.mxu1 }
 0x1a1   : > { %v887_v29 = vadd.f32 %v2639_v46, %v2621_v30  ;;  %v971_v46 = vadd.f32 %v2635_v41, %v2617_v28  ;;  %v903_v31 = vmax.f32 %v885_v0, 0.0  ;;  %v829_v33 = vadd.f32 %v821_v38, %v743_v16 }
 0x1a2   : > { %v888_v58 = vpop.f32.mrf.mxu0  ;;  %v2656_v3 = vpop.f32.mrf.mxu1 }
 0x1a3   : > { %v889_v2 = vadd.f32 %v888_v58, %v2617_v28  ;;  %v904_v9 = vmax.f32 %v887_v29, 0.0  ;;  %v973_v58 = vadd.f32 %v2642_v49, %v2621_v30  ;;  %v989_v36 = vmax.f32 %v971_v46, 0.0 }
 0x1a4   : > { %v890_v19 = vpop.f32.mrf.mxu0  ;;  %v976_v35 = vpop.f32.mrf.mxu1  ;;  %v975_v41 = vadd.f32 %v2656_v3, %v2617_v28  ;;  %v911_v42 = vadd.f32 %v903_v31, %v825_v54 }
 0x1a5   : > { %v891_v22 = vadd.f32 %v890_v19, %v2621_v30  ;;  %v744_v19 = vadd.f32 %v736_v1, %v658_v51  ;;  %v905_v11 = vmax.f32 %v889_v2, 0.0  ;;  %v977_v39 = vadd.f32 %v976_v35, %v2621_v30 }
 0x1a6   : > { %v894_v43 = vpop.f32.mrf.mxu0  ;;  %v980_v44 = vpop.f32.mrf.mxu1  ;;  %v912_v49 = vadd.f32 %v904_v9, %v826_v57  ;;  %v990_v14 = vmax.f32 %v973_v58, 0.0  ;;  %v991_v50 = vmax.f32 %v975_v41, 0.0  ;;  %v997_v59 = vadd.f32 %v989_v36, %v911_v42 }
 0x1a7   : > { %v906_v25 = vmax.f32 %v891_v22, 0.0  ;;  %v895_v32 = vadd.f32 %v894_v43, %v2617_v28  ;;  %v830_v45 = vadd.f32 %v822_v8, %v744_v19  ;;  %v913_v48 = vadd.f32 %v905_v11, %v827_v4 }
 0x1a8   : > { %v896_v61 = vpop.f32.mrf.mxu0  ;;  %v982_v62 = vpop.f32.mrf.mxu1  ;;  %v2697_v47 = vadd.f32 %v980_v44, %v2617_v28  ;;  %v992_v55 = vmax.f32 %v977_v39, 0.0  ;;  %v998_v60 = vadd.f32 %v990_v14, %v912_v49 }
 0x1a9   : > { %v897_v18 = vadd.f32 %v896_v61, %v2621_v30  ;;  %v914_v51 = vadd.f32 %v906_v25, %v828_v5  ;;  %v907_v3 = vmax.f32 %v895_v32, 0.0  ;;  %v983_v56 = vadd.f32 %v982_v62, %v2621_v30 }
 0x1aa   : > { %v898_v6 = vpop.f32.mrf.mxu0  ;;  %v984_v7 = vpop.f32.mrf.mxu1  ;;  %v999_v61 = vadd.f32 %v991_v50, %v913_v48  ;;  %v993_v24 = vmax.f32 %v2697_v47, 0.0 }
 0x1ab   : > { %v899_v54 = vadd.f32 %v898_v6, %v2617_v28  ;;  %v908_v20 = vmax.f32 %v897_v18, 0.0  ;;  %v1000_v63 = vadd.f32 %v992_v55, %v914_v51  ;;  %v915_v34 = vadd.f32 %v907_v3, %v829_v33 }
 0x1ac   : > { %v900_v15 = vpop.f32.mrf.mxu0  ;;  %v986_v40 = vpop.f32.mrf.mxu1  ;;  %v994_v10 = vmax.f32 %v983_v56, 0.0  ;;  %v985_v13 = vadd.f32 %v984_v7, %v2617_v28 }
 0x1ad   : > { %v901_v0 = vadd.f32 %v900_v15, %v2621_v30  ;;  %v909_v4 = vmax.f32 %v899_v54, 0.0  ;;  %v916_v38 = vadd.f32 %v908_v20, %v830_v45  ;;  %v987_v9 = vadd.f32 %v986_v40, %v2621_v30 }
 0x1ae   : > { %v995_v32 = vmax.f32 %v985_v13, 0.0  ;;  %v1001_v20 = vadd.f32 %v993_v24, %v915_v34 }
 0x1af   : > { %v910_v31 = vmax.f32 %v901_v0, 0.0  ;;  %v917_v12 = vadd.f32 %v909_v4, %v831_v53  ;;  %v1002_v14 = vadd.f32 %v994_v10, %v916_v38  ;;  %v996_v45 = vmax.f32 %v987_v9, 0.0 }
 0x1b1   : > { %v918_v18 = vadd.f32 %v910_v31, %v832_v17 }
 0x1b3   : > { %v1004_v0 = vadd.f32 %v996_v45, %v918_v18 }
 0x1be   : > { %v1056_v43 = vpop.f32.mrf.mxu0  ;;  %v1142_v52 = vpop.f32.mrf.mxu1 }
 0x1bf   : > { %v1057_v35 = vadd.f32 %v1056_v43, %v2617_v28  ;;  %v1143_v22 = vadd.f32 %v1142_v52, %v2617_v28 }
 0x1c0   : > { %v1058_v21 = vpop.f32.mrf.mxu0  ;;  %v1144_v57 = vpop.f32.mrf.mxu1 }
 0x1c1   : > { %v1059_v44 = vadd.f32 %v1058_v21, %v2621_v30  ;;  %v1075_v2 = vmax.f32 %v1057_v35, 0.0  ;;  %v1145_v58 = vadd.f32 %v1144_v57, %v2621_v30  ;;  %v1161_v7 = vmax.f32 %v1143_v22, 0.0 }
 0x1c2   : > { %v1060_v29 = vpop.f32.mrf.mxu0  ;;  %v1146_v1 = vpop.f32.mrf.mxu1 }
 0x1c3   : > { %v1061_v62 = vadd.f32 %v1060_v29, %v2617_v28  ;;  %v1076_v27 = vmax.f32 %v1059_v44, 0.0  ;;  %v1147_v6 = vadd.f32 %v1146_v1, %v2617_v28  ;;  %v1083_v25 = vadd.f32 %v1075_v2, %v997_v59 }
 0x1c4   : > { %v1062_v5 = vpop.f32.mrf.mxu0  ;;  %v1148_v16 = vpop.f32.mrf.mxu1  ;;  %v1162_v48 = vmax.f32 %v1145_v58, 0.0  ;;  %v1003_v44 = vadd.f32 %v995_v32, %v917_v12 }
 0x1c5   : > { %v1077_v46 = vmax.f32 %v1061_v62, 0.0  ;;  %v1063_v8 = vadd.f32 %v1062_v5, %v2621_v30  ;;  %v1149_v19 = vadd.f32 %v1148_v16, %v2621_v30  ;;  %v1084_v33 = vadd.f32 %v1076_v27, %v998_v60 }
 0x1c6   : > { %v1066_v23 = vpop.f32.mrf.mxu0  ;;  %v1152_v11 = vpop.f32.mrf.mxu1  ;;  %v1163_v15 = vmax.f32 %v1147_v6, 0.0  ;;  %v1169_v43 = vadd.f32 %v1161_v7, %v1083_v25 }
 0x1c7   : > { %v1085_v26 = vadd.f32 %v1077_v46, %v999_v61  ;;  %v1078_v37 = vmax.f32 %v1063_v8, 0.0  ;;  %v1067_v36 = vadd.f32 %v1066_v23, %v2617_v28  ;;  %v1164_v40 = vmax.f32 %v1149_v19, 0.0 }
 0x1c8   : > { %v1068_v41 = vpop.f32.mrf.mxu0  ;;  %v1154_v39 = vpop.f32.mrf.mxu1  ;;  %v1170_v35 = vadd.f32 %v1162_v48, %v1084_v33  ;;  %v1153_v55 = vadd.f32 %v1152_v11, %v2617_v28 }
 0x1c9   : > { %v1086_v42 = vadd.f32 %v1078_v37, %v1000_v63  ;;  %v1069_v49 = vadd.f32 %v1068_v41, %v2621_v30  ;;  %v1171_v52 = vadd.f32 %v1163_v15, %v1085_v26  ;;  %v1079_v50 = vmax.f32 %v1067_v36, 0.0 }
 0x1ca   : > { %v1070_v51 = vpop.f32.mrf.mxu0  ;;  %v1156_v47 = vpop.f32.mrf.mxu1  ;;  %v1155_v57 = vadd.f32 %v1154_v39, %v2621_v30  ;;  %v1165_v62 = vmax.f32 %v1153_v55, 0.0 }
 0x1cb   : > { %v1172_v53 = vadd.f32 %v1164_v40, %v1086_v42  ;;  %v1080_v3 = vmax.f32 %v1069_v49, 0.0  ;;  %v1071_v54 = vadd.f32 %v1070_v51, %v2617_v28  ;;  %v1157_v17 = vadd.f32 %v1156_v47, %v2617_v28 }
 0x1cc   : > { %v1072_v56 = vpop.f32.mrf.mxu0  ;;  %v1158_v21 = vpop.f32.mrf.mxu1  ;;  %v1306_v29 = vpack.c.bf16 %v1171_v52, %v1169_v43  ;;  %v1087_v22 = vadd.f32 %v1079_v50, %v1001_v20  ;;  %v1166_v10 = vmax.f32 %v1155_v57, 0.0 }
 0x1cd   : > { %v1073_v59 = vadd.f32 %v1072_v56, %v2621_v30  ;;  %v1159_v60 = vadd.f32 %v1158_v21, %v2621_v30  ;;  %v1081_v61 = vmax.f32 %v1071_v54, 0.0  ;;  %v1307_v63 = vpack.c.bf16 %v1172_v53, %v1170_v35 }
 0x1ce   : > { %v1088_v1 = vadd.f32 %v1080_v3, %v1002_v14  ;;  %v1167_v13 = vmax.f32 %v1157_v17, 0.0  ;;  %v1173_v34 = vadd.f32 %v1165_v62, %v1087_v22 }
 0x1cf   : > { %v1082_v2 = vmax.f32 %v1073_v59, 0.0  ;;  %v1089_v4 = vadd.f32 %v1081_v61, %v1003_v44  ;;  %1470 = vmatprep.mubr.bf16.mxu1 %v1307_v63  ;;  %v1168_v27 = vmax.f32 %v1159_v60, 0.0 }
 0x1d0   : > { %1471 = vmatmul.mubr.bf16.vlgmr.msra.gmra.mxu1 %v1306_v29  ;;  %v1174_v5 = vadd.f32 %v1166_v10, %v1088_v1 }
 0x1d1   : > { %v1090_v28 = vadd.f32 %v1082_v2, %v1004_v0  ;;  %v1175_v30 = vadd.f32 %v1167_v13, %v1089_v4 }
 0x1d3   : > { %v1176_v24 = vadd.f32 %v1168_v27, %v1090_v28  ;;  %v1308_v38 = vpack.c.bf16 %v1175_v30, %v1173_v34 }
 0x1d5   : > { %v1309_v16 = vpack.c.bf16 %v1176_v24, %v1174_v5 }
 0x1d7   : > { %1478 = vmatprep.mubr.bf16.mxu1 %v1309_v16 }
 0x1d8   : > { %1479 = vmatmul.mubr.bf16.gmra.mxu1 %v1308_v38 }
 0x1df   : > { %v1815_v46 = vpop.f32.mrf.mxu0 }
 0x1e0   : > { %v1489_v8 = vmax.f32 %v1815_v46, 0.0 }
 0x1e1   : > { %v1291_v6 = vpop.f32.mrf.mxu0 }
 0x1e2   : > { %v1487_v31 = vmax.f32 %v1291_v6, 0.0  ;;  %1493 = vst [vmem:[%s2722_s26 + $0x20] sm:$0xff] %v1489_v8 }
 0x1e3   : > { %v1816_v9 = vpop.f32.mrf.mxu0 }
 0x1e4   : > { %1491 = vst [vmem:[%s2722_s26] sm:$0xff] %v1487_v31  ;;  %v1490_v19 = vmax.f32 %v1816_v9, 0.0 }
 0x1e5   : > { %v1294_v58 = vpop.f32.mrf.mxu0 }
 0x1e6   : > { %v1488_v23 = vmax.f32 %v1294_v58, 0.0  ;;  %1494 = vst [vmem:[%s2722_s26 + $0x30] sm:$0xff] %v1490_v19 }
 0x1e8   : > { %1492 = vst [vmem:[%s2722_s26 + $0x10] sm:$0xff] %v1488_v23 }
 0x290   : > { %v1785_v11 = vpop.f32.mrf.mxu1 }
 0x292   : > { %v1786_v25 = vpop.f32.mrf.mxu1 }
 0x293   : > { %v1787_v7 = vadd.f32 %v1786_v25, %v1785_v11 }
 0x294   : > { %v1788_v26 = vpop.f32.mrf.mxu1 }
 0x295   : > { %v1495_v37 = vmax.f32 %v1787_v7, 0.0 }
 0x296   : > { %v1789_v12 = vpop.f32.mrf.mxu1 }
 0x297   : > { %1499 = vst [vmem:[%s2722_s26 + $0x8] sm:$0xff] %v1495_v37  ;;  %v1790_v32 = vadd.f32 %v1789_v12, %v1788_v26 }
 0x298   : > { %v1791_v33 = vpop.f32.mrf.mxu1 }
 0x299   : > { %v1496_v36 = vmax.f32 %v1790_v32, 0.0 }
 0x29a   : > { %v1792_v41 = vpop.f32.mrf.mxu1 }
 0x29b   : > { %1500 = vst [vmem:[%s2722_s26 + $0x18] sm:$0xff] %v1496_v36  ;;  %v1793_v39 = vadd.f32 %v1792_v41, %v1791_v33 }
 0x29c   : > { %v1794_v15 = vpop.f32.mrf.mxu1 }
 0x29d   : > { %v1497_v42 = vmax.f32 %v1793_v39, 0.0 }
 0x29e   : > { %v1795_v40 = vpop.f32.mrf.mxu1 }
 0x29f   : > { %1501 = vst [vmem:[%s2722_s26 + $0x28] sm:$0xff] %v1497_v42  ;;  %v1796_v49 = vadd.f32 %v1795_v40, %v1794_v15 }
 0x2a1   : > { %v1498_v14 = vmax.f32 %v1796_v49, 0.0 }
 0x2a3   : > { %1502 = vst [vmem:[%s2722_s26 + $0x38] sm:$0xff] %v1498_v14 }
 0x2a4   : > { %2095 = shalt.err (!%p2092_p4)
}
 0x2a5   : > { %s2096_s7 = scalar_lea.hbm %s2738_s18, 1024  ;;  %s2100_s8 = scalar_lea.hbm %s2787_s6, 4096 }
 0x2a6   : > { %p2097_p2 = scmp.ne.s32.totalorder %s2738_s18, %s2096_s7  ;;  %p2101_p11 = scmp.lt.s32.totalorder %s2738_s18, %s2787_s6 }
 0x2a7   : > { %p2102_p13 = scmp.lt.s32.totalorder %s2100_s8, %s2096_s7 }
 0x2a8   : > { %p2098_p6 = pnand %p2097_p2, %p2808_p7 }
 0x2a9   : > { %p2103_p0 = por %p2102_p13, %p2101_p11 }
 0x2aa   : > { %p2099_p5 = pneg %p2098_p6 }
 0x2ac   : > { %p2104_p3 = pnand %p2103_p0, %p2099_p5 }
 0x2ae   : > { %2107 = shalt.err (!%p2104_p3)
}
 0x2af   : > { %s2177_s26 = smov 256   ;;  %s2178_s17 = smov 16  }
 0x2b0   : > { %1840 = dma.vmem_to_hbm [thread:$0]  (%p2808_p7), %s2732_s29, 1024, %s2738_s18, %s1504_s19, %s2177_s26, %s2177_s26, %s2178_s17  }
 0x2b1 PF: > { %p1862_p12 = scmp.ge.s32.totalorder %s2158_s24, 2  ;;  %s1533_s12 = sand.u32 1, %s2146_s21  }
 0x2b2   : > { %p2809_p9 = scmp.ne.s32.totalorder %s2797_s10, 0  ;;  %s1534_s14 = scalar_lea.sflag [#allocation4], %s1533_s12 }
 0x2b4   : > { %p1853_p8 = pnand %p1862_p12, %p2809_p9 }
 0x2b6   : > { %p1854_p10 = pneg %p1853_p8 }
 0x2b8   : > { %2141 = dma.done.wait (%p1854_p10), %s1534_s14, 1024  }
 0x2b9   : > { %2143 = vsyncadd (%p1854_p10), %s1534_s14, 4294966272  ;;  %p23_p1 = scmp.ge.s32.totalorder %s2239_s27, 6   ;;  %s2810_s21 = smov %s2150_s22 }
 0x2ba   : > { %s2811_s22 = smov %s2154_s23  ;;  %s2812_s23 = smov %s2251_s30 }
 0x2bb   : > { %s2813_s24 = smov %s2239_s27  ;;  %25 = sbr.rel (!%p23_p1) target bundleno = 11 (0xb), region = 126 }
 0x2c0   :  { %1539 = vsyncpa [#allocation3], 1 }
 0x2c1   :  { %1541 = vsyncpa [#allocation3 + $0x1], 1 }
 0x2c2   :  { %1542 = vsyncpa [#allocation6], 1 }
 0x2c3   :  { %1544 = vsyncpa [#allocation6 + $0x1], 1 }
 0x2c4   :  { %1545 = vsyncpa [#allocation9], 1 }
 0x2c5   :  { %1546 = vsyncpa [#allocation4], 1 }
 0x2c6   :  { %1548 = vsyncpa [#allocation4 + $0x1], 1 }

</bundles_post_ra>
